<compile_context>
chip_gen: v7x
topology: tpu7x:2x2x1
jax: 0.10.0
libtpu: 0.0.40
codegen_flags: <defaults>
</compile_context>

<pallas_src>
import functools

import jax
import jax.numpy as jnp
from jax import lax
from jax.experimental import pallas as pl
from jax.experimental.pallas import tpu as pltpu


def _round_up(x, m):
    return ((x + m - 1) // m) * m


def _tpu_config():
    """Best-effort chip detection; falls back to safe defaults."""
    kind = ""
    try:
        kind = jax.devices()[0].device_kind.lower()
    except Exception:
        kind = ""
    # Chips with two TensorCores behind one device (megacore sharding works).
    multi_tc = ("v7" in kind) or ("7x" in kind) or ("v4" in kind) or ("v5p" in kind)
    # bf16 VPU/EUP available (keep f32 compute elsewhere, e.g. v5e).
    bf16_ok = ("v6" in kind) or ("v7" in kind) or ("7x" in kind)
    if ("v7" in kind) or ("7x" in kind):
        vmem_limit = 48 * 1024 * 1024          # 64 MiB physical on v7x
    elif kind:
        vmem_limit = 64 * 1024 * 1024          # 128 MiB physical on v4/v5/v6
    else:
        vmem_limit = 32 * 1024 * 1024          # unknown: conservative
    return multi_tc, bf16_ok, vmem_limit


def _logit_penalty_kernel(logits_ref, labels_ref, out_ref, acc_ref, *,
                          scale, beta, batch_tile, tiles_per_split,
                          num_tiles, total_b, compute_dtype):
    s = pl.program_id(0)   # core-split index (parallel)
    j = pl.program_id(1)   # batch-tile index within the split (arbitrary)

    # Zero the per-split running accumulator at the start of each split.
    @pl.when(j == 0)
    def _():
        acc_ref[...] = jnp.zeros_like(acc_ref)

    tile_idx = s * tiles_per_split + j

    # Padded / duplicated grid steps (ragged split remainder) skip all compute.
    @pl.when(tile_idx < num_tiles)
    def _():
        x = logits_ref[...]                                     # (TB, C)
        if x.dtype != compute_dtype:
            x = x.astype(compute_dtype)
        labels = labels_ref[...]                                # (TB, 1) int32

        # Numerically stable log-sum-exp along the class (lane) axis.
        m = jnp.max(x, axis=-1, keepdims=True)
        e = jnp.exp(x - m)                                      # EUP (bf16 ok)
        sum_e = jnp.sum(e.astype(jnp.float32), axis=-1, keepdims=True)
        lse = m.astype(jnp.float32) + jnp.log(sum_e)            # (TB, 1) f32

        # Gather the logit at the label index via a one-hot select
        # (no dynamic gather on TPU).
        col = lax.broadcasted_iota(jnp.int32, x.shape, 1)
        onehot = jnp.where(col == labels, x, jnp.zeros_like(x))
        correct = jnp.sum(onehot.astype(jnp.float32), axis=-1, keepdims=True)

        sumsq = jnp.sum((x * x).astype(jnp.float32), axis=-1, keepdims=True)

        per_sample = (lse - correct) + (beta * 0.5) * sumsq     # (TB, 1) f32

        # Mask rows past the true batch size (ragged tail).
        row = lax.broadcasted_iota(jnp.int32, per_sample.shape, 0)
        global_row = tile_idx * batch_tile + row
        per_sample = jnp.where(global_row < total_b, per_sample, 0.0)

        # Single (1,1) accumulate per step (sublane reduce on the XLU, which
        # has slack); avoids a column of masked single-lane stores.
        acc_ref[...] += jnp.sum(per_sample, axis=0, keepdims=True)

    # Finalize: scale once by weight/B and write element [0,0] of this
    # split's lane-dense (8,128) output block.
    @pl.when(j == tiles_per_split - 1)
    def _():
        ridx = lax.broadcasted_iota(jnp.int32, out_ref.shape, 0)
        cidx = lax.broadcasted_iota(jnp.int32, out_ref.shape, 1)
        out_ref[...] = jnp.where((ridx == 0) & (cidx == 0),
                                 acc_ref[...] * scale, 0.0)


def logit_penalty(logits, labels, weight=1.0, beta=0.002,
                  batch_tile=None, core_splits=None):
    """logits: (B, C) float (f32 or bf16), labels: (B,) int  ->  scalar f32 loss."""
    B, C = logits.shape
    multi_tc, bf16_ok, vmem_limit = _tpu_config()

    in_dtype = jnp.dtype(logits.dtype)
    compute_bf16 = (in_dtype == jnp.dtype(jnp.bfloat16)) and bf16_ok
    compute_dtype = jnp.dtype(jnp.bfloat16) if compute_bf16 else jnp.dtype(jnp.float32)

    in_itemsize = in_dtype.itemsize
    comp_itemsize = compute_dtype.itemsize
    granule = 16 if in_itemsize == 2 else 8      # sublane packing granularity

    if batch_tile is None:
        # Per-row VMEM footprint (lane-padded): double-buffered logits stream
        # + ~3 full-width compute-dtype temporaries + the int32 column iota.
        c_pad = _round_up(C, 128)
        bytes_per_row = 2 * c_pad * in_itemsize + 3 * c_pad * comp_itemsize + 4 * c_pad
        budget = max(vmem_limit - 4 * 1024 * 1024, 4 * 1024 * 1024)
        rows = max(granule, budget // bytes_per_row)
        rows = min(int(rows), _round_up(B, granule))   # capped only by B
        batch_tile = max(granule, (rows // granule) * granule)
        # TODO(synk): if even one granule exceeds the budget (huge-vocab bf16),
        # switch to a class-axis reduction grid dim with online-LSE scratch.

    num_tiles = -(-B // batch_tile)
    if core_splits is None:
        core_splits = 2 if (multi_tc and num_tiles >= 2) else 1
    core_splits = max(1, min(int(core_splits), num_tiles))
    tiles_per_split = -(-num_tiles // core_splits)
    last_block = num_tiles - 1

    labels2d = labels.astype(jnp.int32).reshape(B, 1)
    scale = float(weight) / float(B)

    kernel = functools.partial(
        _logit_penalty_kernel,
        scale=scale, beta=float(beta), batch_tile=batch_tile,
        tiles_per_split=tiles_per_split, num_tiles=num_tiles, total_b=B,
        compute_dtype=compute_dtype)

    def _tile_index(s, j):
        # Clamp so padded steps map to the SAME block as the previous valid
        # step (no re-DMA); their compute is skipped inside the kernel.
        return (jnp.minimum(s * tiles_per_split + j, last_block), 0)

    out = pl.pallas_call(
        kernel,
        out_shape=jax.ShapeDtypeStruct((core_splits * 8, 128), jnp.float32),
        grid_spec=pltpu.PrefetchScalarGridSpec(
            num_scalar_prefetch=0,
            grid=(core_splits, tiles_per_split),
            in_specs=[
                pl.BlockSpec((batch_tile, C), _tile_index),
                pl.BlockSpec((batch_tile, 1), _tile_index),
            ],
            out_specs=pl.BlockSpec((8, 128), lambda s, j: (s, 0)),
            scratch_shapes=[pltpu.VMEM((1, 1), jnp.float32)],
        ),
        compiler_params=pltpu.CompilerParams(
            dimension_semantics=("parallel", "arbitrary"),
            vmem_limit_bytes=int(vmem_limit)),
    )(logits, labels2d)

    # Only element [0, 0] of each split's (8, 128) block is non-zero.
    return jnp.sum(out)


def _reference(logits, labels, weight=1.0, beta=0.002):
    logits = logits.astype(jnp.float32)
    lse = jax.scipy.special.logsumexp(logits, axis=-1)
    correct = jnp.take_along_axis(logits, labels[:, None], axis=-1)[:, 0]
    xent = lse - correct
    penalty = beta * jnp.sum(logits ** 2, axis=-1) / 2
    return jnp.mean(xent * weight) + jnp.mean(penalty * weight)


if __name__ == "__main__":
    key = jax.random.PRNGKey(0)

    # Test 1: small, evenly tiled batch with default (budget-derived) tiling.
    k1, k2 = jax.random.split(key)
    B, C = 8, 32
    logits = jax.random.normal(k1, (B, C), dtype=jnp.float32)
    labels = jax.random.randint(k2, (B,), 0, C, dtype=jnp.int32)

    loss = logit_penalty(logits, labels, weight=1.0, beta=0.002)
    loss = jax.block_until_ready(loss)
    ref = _reference(logits, labels, weight=1.0, beta=0.002)
    assert jnp.allclose(loss, ref, rtol=1e-5, atol=1e-5), (loss, ref)

    # Test 2: ragged batch with an explicit tile and forced 2-way split ->
    # exercises the split remainder (skipped duplicate step) and tail masking.
    k3, k4 = jax.random.split(k2)
    B2, C2 = 20, 32
    logits2 = jax.random.normal(k3, (B2, C2), dtype=jnp.float32)
    labels2 = jax.random.randint(k4, (B2,), 0, C2, dtype=jnp.int32)

    loss2 = logit_penalty(logits2, labels2, weight=0.5, beta=0.01,
                          batch_tile=8, core_splits=2)
    loss2 = jax.block_until_ready(loss2)
    ref2 = _reference(logits2, labels2, weight=0.5, beta=0.01)
    assert jnp.allclose(loss2, ref2, rtol=1e-5, atol=1e-5), (loss2, ref2)

    # Test 3: bf16 logits -> bf16 streamed as bf16; on v6e/v7x the elementwise
    # passes also stay bf16 (loose tolerance vs. the f32 reference).
    k5, k6 = jax.random.split(k4)
    B3, C3 = 16, 64
    logits3 = jax.random.normal(k5, (B3, C3), dtype=jnp.bfloat16)
    labels3 = jax.random.randint(k6, (B3,), 0, C3, dtype=jnp.int32)

    loss3 = logit_penalty(logits3, labels3, weight=1.0, beta=0.002)
    loss3 = jax.block_until_ready(loss3)
    ref3 = _reference(logits3, labels3, weight=1.0, beta=0.002)
    assert jnp.allclose(loss3, ref3, rtol=2e-2, atol=2e-2), (loss3, ref3)

    print("KERNEL_OK")
</pallas_src>

<mosaic_0001>
module attributes {stable_mosaic.version = 11 : i64} {
  func.func @_logit_penalty_kernel(%arg0: i32, %arg1: i32, %arg2: memref<8x32xf32, #tpu.memory_space<vmem>>, %arg3: memref<8x1xi32, #tpu.memory_space<vmem>>, %arg4: memref<8x128xf32, #tpu.memory_space<vmem>>, %arg5: memref<1x1xf32, #tpu.memory_space<vmem>>) attributes {dimension_semantics = [#tpu.dimension_semantics<parallel>, #tpu.dimension_semantics<arbitrary>], iteration_bounds = array<i64: 1, 1>, scalar_prefetch = 0 : i64, scratch_operands = 1 : i64, tpu.core_type = #tpu.core_type<tc>, window_params = [{transform_indices = @transform_0, window_bounds = array<i64: 8, 32>}, {transform_indices = @transform_1, window_bounds = array<i64: 8, 1>}, {transform_indices = @transform_2, window_bounds = array<i64: 8, 128>}]} {
    %c0_i32 = arith.constant 0 : i32
    %0 = arith.cmpi eq, %arg1, %c0_i32 : i32
    %1 = arith.extui %0 : i1 to i32
    %c0_i32_0 = arith.constant 0 : i32
    %2 = arith.cmpi ne, %1, %c0_i32_0 : i32
    scf.if %2 {
      %cst = arith.constant 0.000000e+00 : f32
      %11 = vector.broadcast %cst : f32 to vector<1x1xf32>
      %c0 = arith.constant 0 : index
      %c0_5 = arith.constant 0 : index
      %12 = vector.load %arg5[%c0, %c0_5] : memref<1x1xf32, #tpu.memory_space<vmem>>, vector<1x1xf32>
      tpu.vector_store %arg5[%c0, %c0_5], %11 {strides = array<i32>} : memref<1x1xf32, #tpu.memory_space<vmem>>, vector<1x1xf32>,
    } else {
    }
    %c1_i32 = arith.constant 1 : i32
    %3 = arith.muli %arg0, %c1_i32 : i32
    %4 = arith.addi %3, %arg1 : i32
    %c1_i32_1 = arith.constant 1 : i32
    %5 = arith.cmpi slt, %4, %c1_i32_1 : i32
    %6 = arith.extui %5 : i1 to i32
    %c0_i32_2 = arith.constant 0 : i32
    %7 = arith.cmpi ne, %6, %c0_i32_2 : i32
    scf.if %7 {
      %c0 = arith.constant 0 : index
      %c0_5 = arith.constant 0 : index
      %11 = vector.load %arg2[%c0, %c0_5] : memref<8x32xf32, #tpu.memory_space<vmem>>, vector<8x32xf32>
      %c0_6 = arith.constant 0 : index
      %c0_7 = arith.constant 0 : index
      %12 = vector.load %arg3[%c0_6, %c0_7] : memref<8x1xi32, #tpu.memory_space<vmem>>, vector<8x1xi32>
      %cst = arith.constant dense<0xFF800000> : vector<8xf32>
      %13 = vector.multi_reduction <maximumf>, %11, %cst [1] : vector<8x32xf32> to vector<8xf32>
      %14 = vector.shape_cast %13 : vector<8xf32> to vector<8x1xf32>
      %15 = vector.broadcast %14 : vector<8x1xf32> to vector<8x32xf32>
      %16 = arith.subf %11, %15 : vector<8x32xf32>
      %17 = math.exp %16 : vector<8x32xf32>
      %cst_8 = arith.constant dense<0.000000e+00> : vector<8xf32>
      %18 = vector.multi_reduction <add>, %17, %cst_8 [1] : vector<8x32xf32> to vector<8xf32>
      %19 = vector.shape_cast %18 : vector<8xf32> to vector<8x1xf32>
      %20 = math.log %19 : vector<8x1xf32>
      %21 = arith.addf %14, %20 : vector<8x1xf32>
      %22 = tpu.iota {dimensions = array<i32: 1>} : vector<8x32xi32>
      %23 = vector.broadcast %12 : vector<8x1xi32> to vector<8x32xi32>
      %24 = arith.cmpi eq, %22, %23 : vector<8x32xi32>
      %cst_9 = arith.constant 0.000000e+00 : f32
      %25 = vector.broadcast %cst_9 : f32 to vector<8x32xf32>
      %26 = arith.select %24, %11, %25 : vector<8x32xi1>, vector<8x32xf32>
      %cst_10 = arith.constant dense<0.000000e+00> : vector<8xf32>
      %27 = vector.multi_reduction <add>, %26, %cst_10 [1] : vector<8x32xf32> to vector<8xf32>
      %28 = vector.shape_cast %27 : vector<8xf32> to vector<8x1xf32>
      %29 = arith.mulf %11, %11 : vector<8x32xf32>
      %cst_11 = arith.constant dense<0.000000e+00> : vector<8xf32>
      %30 = vector.multi_reduction <add>, %29, %cst_11 [1] : vector<8x32xf32> to vector<8xf32>
      %31 = vector.shape_cast %30 : vector<8xf32> to vector<8x1xf32>
      %32 = arith.subf %21, %28 : vector<8x1xf32>
      %cst_12 = arith.constant 1.000000e-03 : f32
      %33 = vector.broadcast %cst_12 : f32 to vector<8x1xf32>
      %34 = arith.mulf %33, %31 : vector<8x1xf32>
      %35 = arith.addf %32, %34 : vector<8x1xf32>
      %36 = tpu.iota {dimensions = array<i32: 0>} : vector<8x1xi32>
      %c8_i32 = arith.constant 8 : i32
      %37 = arith.muli %4, %c8_i32 : i32
      %38 = vector.broadcast %37 : i32 to vector<8x1xi32>
      %39 = arith.addi %38, %36 : vector<8x1xi32>
      %c8_i32_13 = arith.constant 8 : i32
      %40 = vector.broadcast %c8_i32_13 : i32 to vector<8x1xi32>
      %41 = arith.cmpi slt, %39, %40 : vector<8x1xi32>
      %cst_14 = arith.constant 0.000000e+00 : f32
      %42 = vector.broadcast %cst_14 : f32 to vector<8x1xf32>
      %43 = arith.select %41, %35, %42 : vector<8x1xi1>, vector<8x1xf32>
      %c0_15 = arith.constant 0 : index
      %c0_16 = arith.constant 0 : index
      %44 = vector.load %arg5[%c0_15, %c0_16] : memref<1x1xf32, #tpu.memory_space<vmem>>, vector<1x1xf32>
      %cst_17 = arith.constant dense<0.000000e+00> : vector<1xf32>
      %45 = vector.multi_reduction <add>, %43, %cst_17 [0] : vector<8x1xf32> to vector<1xf32>
      %46 = vector.shape_cast %45 : vector<1xf32> to vector<1x1xf32>
      %47 = arith.addf %44, %46 : vector<1x1xf32>
      %c0_18 = arith.constant 0 : index
      %c0_19 = arith.constant 0 : index
      %48 = vector.load %arg5[%c0_18, %c0_19] : memref<1x1xf32, #tpu.memory_space<vmem>>, vector<1x1xf32>
      tpu.vector_store %arg5[%c0_18, %c0_19], %47 {strides = array<i32>} : memref<1x1xf32, #tpu.memory_space<vmem>>, vector<1x1xf32>,
    } else {
    }
    %c0_i32_3 = arith.constant 0 : i32
    %8 = arith.cmpi eq, %arg1, %c0_i32_3 : i32
    %9 = arith.extui %8 : i1 to i32
    %c0_i32_4 = arith.constant 0 : i32
    %10 = arith.cmpi ne, %9, %c0_i32_4 : i32
    scf.if %10 {
      %11 = tpu.iota {dimensions = array<i32: 0>} : vector<8x128xi32>
      %12 = tpu.iota {dimensions = array<i32: 1>} : vector<8x128xi32>
      %c0_i32_5 = arith.constant 0 : i32
      %13 = vector.broadcast %c0_i32_5 : i32 to vector<8x128xi32>
      %14 = arith.cmpi eq, %11, %13 : vector<8x128xi32>
      %c0_i32_6 = arith.constant 0 : i32
      %15 = vector.broadcast %c0_i32_6 : i32 to vector<8x128xi32>
      %16 = arith.cmpi eq, %12, %15 : vector<8x128xi32>
      %17 = arith.andi %14, %16 : vector<8x128xi1>
      %c0 = arith.constant 0 : index
      %c0_7 = arith.constant 0 : index
      %18 = vector.load %arg5[%c0, %c0_7] : memref<1x1xf32, #tpu.memory_space<vmem>>, vector<1x1xf32>
      %cst = arith.constant 1.250000e-01 : f32
      %19 = vector.broadcast %cst : f32 to vector<1x1xf32>
      %20 = arith.mulf %18, %19 : vector<1x1xf32>
      %cst_8 = arith.constant 0.000000e+00 : f32
      %21 = vector.shape_cast %20 : vector<1x1xf32> to vector<1x1xf32>
      %22 = vector.broadcast %21 : vector<1x1xf32> to vector<8x128xf32>
      %23 = vector.broadcast %cst_8 : f32 to vector<8x128xf32>
      %24 = arith.select %17, %22, %23 : vector<8x128xi1>, vector<8x128xf32>
      %c0_9 = arith.constant 0 : index
      %c0_10 = arith.constant 0 : index
      %25 = vector.load %arg4[%c0_9, %c0_10] : memref<8x128xf32, #tpu.memory_space<vmem>>, vector<8x128xf32>
      tpu.vector_store %arg4[%c0_9, %c0_10], %24 {strides = array<i32>} : memref<8x128xf32, #tpu.memory_space<vmem>>, vector<8x128xf32>,
    } else {
    }
    return
  }
  func.func @transform_0(%arg0: i32, %arg1: i32) -> (i32, i32) {
    %c1_i32 = arith.constant 1 : i32
    %0 = arith.muli %arg0, %c1_i32 : i32
    %1 = arith.addi %0, %arg1 : i32
    %c0_i32 = arith.constant 0 : i32
    %2 = arith.minsi %1, %c0_i32 : i32
    %c0_i32_0 = arith.constant 0 : i32
    %c0_i32_1 = arith.constant 0 : i32
    return %2, %c0_i32_0 : i32, i32
  }
  func.func @transform_1(%arg0: i32, %arg1: i32) -> (i32, i32) {
    %c1_i32 = arith.constant 1 : i32
    %0 = arith.muli %arg0, %c1_i32 : i32
    %1 = arith.addi %0, %arg1 : i32
    %c0_i32 = arith.constant 0 : i32
    %2 = arith.minsi %1, %c0_i32 : i32
    %c0_i32_0 = arith.constant 0 : i32
    %c0_i32_1 = arith.constant 0 : i32
    return %2, %c0_i32_0 : i32, i32
  }
  func.func @transform_2(%arg0: i32, %arg1: i32) -> (i32, i32) {
    %c0_i32 = arith.constant 0 : i32
    %c0_i32_0 = arith.constant 0 : i32
    return %arg0, %c0_i32 : i32, i32
  }
}

</mosaic_0001>

<bundles_post_ra>
// kernel: tpu_custom_call.1
= control target key start
LH: loop header
LB: loop body
LE: loop exit
PB: predicated region body
PF: predicated region fallthrough
CT: control target
= control target key end

     0   :  { %7 = vsyncpa [#allocation4], 0  ;;  %s300_s0 = inlined_call_operand.hbm [shape: f32[8,32], index: 0, kind: input, shape index: {}]   ;;  %s301_s1 = inlined_call_operand.hbm [shape: s32[8,1], index: 1, kind: input, shape index: {}]   ;;  %s302_s2 = inlined_call_operand.hbm [shape: f32[8,128], index: 2, kind: output, shape index: {}]  }
   0x1   :  { %8 = vsyncpa [#allocation7], 0 }
   0x2   :  { %9 = vsyncpa [#allocation5], 0  ;;  %s238_s9 = smov [#allocation3]   ;;  %s239_s11 = smov [#allocation6]  }
   0x3   :  { %s21_s10 = sshll.u32 %s238_s9, 4  ;;  %s36_s12 = sshll.u32 %s239_s11, 4  ;;  %s22_s10 = int_to_ptr.vmem [resolvable:$true] %s21_s10  ;;  %s37_s12 = int_to_ptr.vmem [resolvable:$true] %s36_s12 }
   0x4   :  { %s166_s15 = scalar_lea.hbm %s300_s0, 128 }
   0x5   :  { %p167_p0 = scmp.ne.s32.totalorder %s300_s0, %s166_s15  ;;  %p170_p1 = scmp.lt.u32.totalorder %s166_s15, %s300_s0 }
   0x7   :  { %p172_p2 = pnand %p170_p1, %p167_p0 }
   0x9   :  { %175 = shalt.err (!%p172_p2)
}
   0xa   :  { %s176_s20 = scalar_lea.vmem %s22_s10, 128  ;;  %p181_p4 = scmp.lt.s32.totalorder %s22_s10, %s22_s10 }
   0xb   :  { %p177_p3 = scmp.ne.s32.totalorder %s22_s10, %s176_s20  ;;  %p182_p5 = scmp.lt.s32.totalorder %s176_s20, %s176_s20 }
   0xd   :  { %p183_p6 = por %p182_p5, %p181_p4 }
   0xf   :  { %p184_p7 = pnand %p183_p6, %p177_p3 }
  0x11   :  { %187 = shalt.err (!%p184_p7)
}
  0x12   :  { %24 = dma.hbm_to_vmem [thread:$0]  %s300_s0, 128, %s22_s10, [#allocation4]  }
  0x13   :  { %s188_s25 = scalar_lea.hbm %s301_s1, 128 }
  0x14   :  { %p189_p8 = scmp.ne.s32.totalorder %s301_s1, %s188_s25  ;;  %p192_p9 = scmp.lt.u32.totalorder %s188_s25, %s301_s1 }
  0x16   :  { %p194_p10 = pnand %p192_p9, %p189_p8 }
  0x18   :  { %197 = shalt.err (!%p194_p10)
}
  0x19   :  { %s198_s30 = scalar_lea.vmem %s37_s12, 128  ;;  %p203_p12 = scmp.lt.s32.totalorder %s37_s12, %s37_s12 }
  0x1a   :  { %p199_p11 = scmp.ne.s32.totalorder %s37_s12, %s198_s30  ;;  %p204_p13 = scmp.lt.s32.totalorder %s198_s30, %s198_s30 }
  0x1c   :  { %p205_p0 = por %p204_p13, %p203_p12 }
  0x1e   :  { %p206_p1 = pnand %p205_p0, %p199_p11 }
  0x20   :  { %209 = shalt.err (!%p206_p1)
}
  0x21   :  { %39 = dma.hbm_to_vmem [thread:$0]  %s301_s1, 128, %s37_s12, [#allocation7]  }
  0x22   :  { %232 = dma.done.wait [#allocation4], 128  }
  0x23   :  { %233 = vsyncadd [#allocation4], 4294967168 }
  0x24   :  { %234 = dma.done.wait [#allocation7], 128  }
  0x25   :  { %235 = vsyncadd [#allocation7], 4294967168  ;;  %vm56_vm0 = vcmask 0   ;;  %v240_v0 = vmov 0.0   ;;  %v241_v1 = vmov 0   ;;  %vm65_vm1 = vcmask 261120  }
  0x26   :  { %57 = vst.msk [vmem:[#allocation2] sm:$0x1] %vm56_vm0, %v240_v0  ;;  %160 = vset.pattern.permute.xlu0 %v241_v1  ;;  %161 = vset.pattern.permute.xlu1 %v241_v1  ;;  %v63_v2 = vld [vmem:[#allocation3] sm:$0xff]  ;;  %v64_v4 = vld [vmem:[#allocation6] sm:$0xff]  ;;  %v78_v8 = vlaneseq  ;;  %s242_s1 = smov [#allocation8]  }
  0x27   :  { %v66_v3 = vsel %vm65_vm1, %v63_v2, -inf  ;;  %v88_v15 = vmul.f32 %v63_v2, %v63_v2  ;;  %s141_s4 = sshll.u32 %s242_s1, 4  ;;  %s142_s4 = int_to_ptr.vmem [resolvable:$true] %s141_s4 }
  0x28   :  { %67 = vmax.xlane.f32.xlu0 %v66_v3  ;;  %v79_v9 = vand.u32 127, %v78_v8  ;;  %v116_v34 = vshrl.u32 %v78_v8, 7  ;;  %s210_s5 = scalar_lea.vmem %s142_s4, 128  ;;  %p215_p3 = scmp.lt.s32.totalorder %s142_s4, %s142_s4 }
  0x29   :  { %v89_v16 = vsel %vm65_vm1, %v88_v15, 0.0  ;;  %p211_p2 = scmp.ne.s32.totalorder %s142_s4, %s210_s5  ;;  %p216_p4 = scmp.lt.s32.totalorder %s210_s5, %s210_s5 }
  0x2a   :  { %v127_v35 = vsub.s32 0, %v116_v34  ;;  %vm119_vm3 = vcmp.eq.s32.totalorder %v116_v34, 0  ;;  %vm120_vm4 = vcmp.eq.s32.totalorder %v79_v9, 0 }
  0x2b   :  { %vm121_vm5 = vmand %vm119_vm3, %vm120_vm4  ;;  %p217_p5 = por %p216_p4, %p215_p3 }
  0x2d   :  { %v102_v31 = vld [vmem:[#allocation2] sm:$0x1]  ;;  %p218_p6 = pnand %p217_p5, %p211_p2 }
  0x3e   :  { %81 = vperm.xlu0 %160, %v64_v4  }
  0xb5   :  { %v68_v5 = vpop.xlane.xlu0 %67 }
  0xb6   :  { %v69_v6 = vsub.f32 %v63_v2, %v68_v5 }
  0xb8   :  { %v70_v7 = vmul.f32 1.442695, %v69_v6 }
  0xba   :  { %162 = vpow2.f32 %v70_v7 }
  0xbd   :  { %v82_v10 = vpop.permute.xlu0 %81 }
  0xbe   :  { %vm83_vm2 = vcmp.eq.s32.totalorder %v79_v9, %v82_v10 }
  0xbf   :  { %v84_v12 = vsel %vm83_vm2, %v63_v2, 0.0 }
  0xc0   :  { %v85_v14 = vsel %vm65_vm1, %v84_v12, 0.0 }
  0xc4   :  { %v163_v11 = vpop.eup %162 }
  0xc5   :  { %v72_v13 = vsel %vm65_vm1, %v163_v11, 0.0 }
  0xc6   :  { %73 = vadd.xlane.f32.xlu1 %v72_v13 }
  0xca   :  { %86 = vadd.xlane.f32.xlu1 %v85_v14 }
  0xce   :  { %90 = vadd.xlane.f32.xlu1 %v89_v16 }
 0x153   :  { %v74_v17 = vpop.xlane.xlu1 %73 }
 0x154   :  { %164 = vlog2.f32 %v74_v17 }
 0x157   :  { %v87_v18 = vpop.xlane.xlu1 %86 }
 0x15b   :  { %v91_v20 = vpop.xlane.xlu1 %90 }
 0x15c   :  { %v93_v23 = vmul.f32 0.001, %v91_v20 }
 0x15e   :  { %v165_v19 = vpop.eup %164 }
 0x15f   :  { %v76_v21 = vmul.f32 0.6931472, %v165_v19 }
 0x161   :  { %v77_v22 = vadd.f32 %v76_v21, %v68_v5 }
 0x163   :  { %v92_v24 = vsub.f32 %v77_v22, %v87_v18 }
 0x165   :  { %v94_v25 = vadd.f32 %v93_v23, %v92_v24 }
 0x167   :  { %v103_v26 = vrot.slane %v94_v25, 4 }
 0x169   :  { %v104_v27 = vadd.f32 %v103_v26, %v94_v25 }
 0x16b   :  { %v105_v28 = vrot.slane %v104_v27, 2 }
 0x16d   :  { %v106_v29 = vadd.f32 %v105_v28, %v104_v27 }
 0x16f   :  { %v107_v30 = vrot.slane %v106_v29, 1 }
 0x171   :  { %v108_v32 = vadd.f32 %v107_v30, %v106_v29 }
 0x173   :  { %v109_v33 = vadd.f32 %v108_v32, %v102_v31 }
 0x175   :  { %111 = vst.msk [vmem:[#allocation2] sm:$0x1] %vm56_vm0, %v109_v33 }
 0x17c   :  { %v122_v36 = vld [vmem:[#allocation2] sm:$0x1] }
 0x17d   :  { %v123_v37 = vmul.f32 0.125, %v122_v36 }
 0x17f   :  { %v128_v38 = vrot.slane %v123_v37, %v127_v35 }
 0x181   :  { %130 = vperm.xlu1 %161, %v128_v38  }
 0x200   :  { %v131_v39 = vpop.permute.xlu1 %130 }
 0x201   :  { %v133_v40 = vsel %vm121_vm5, %v131_v39, 0.0 }
 0x202   :  { %134 = vst [vmem:[#allocation8] sm:$0xff] %v133_v40 }
 0x203   :  { %221 = shalt.err (!%p218_p6)
}
 0x204   :  { %s222_s8 = scalar_lea.hbm %s302_s2, 128 }
 0x205   :  { %p223_p7 = scmp.ne.s32.totalorder %s302_s2, %s222_s8  ;;  %p226_p8 = scmp.lt.u32.totalorder %s222_s8, %s302_s2 }
 0x207   :  { %p228_p9 = pnand %p226_p8, %p223_p7 }
 0x209   :  { %231 = shalt.err (!%p228_p9)
}
 0x20a   :  { %144 = dma.vmem_to_hbm [thread:$0]  %s142_s4, 128, %s302_s2, [#allocation5]  }
 0x20b   :  { %236 = dma.done.wait [#allocation5], 128  }
 0x20c   :  { %237 = vsyncadd [#allocation5], 4294967168 }
 0x20d   :  { %148 = vsyncpa [#allocation4], 1 }
 0x20e   :  { %149 = vsyncpa [#allocation7], 1 }
 0x20f   :  { %150 = vsyncpa [#allocation5], 1 }

</bundles_post_ra>
